<compile_context>
chip_gen: v5e
topology: v5e:2x2
jax: 0.10.0
libtpu: 0.0.40
codegen_flags: <defaults>
</compile_context>

<pallas_src>
import functools
import math

import jax
import jax.numpy as jnp
from jax import lax
from jax.experimental import pallas as pl
from jax.experimental.pallas import tpu as pltpu

_LANES = 128


def _round_up(a, b):
    return ((a + b - 1) // b) * b


def _rowsum_kernel(x_ref, out_ref, *, size, tv, need_col_mask):
    # x_ref:   (TM, TV)   log-probs tile (native dtype)
    # out_ref: (TM, 128)  f32 per-row / per-lane partial sums, resident over j
    j = pl.program_id(1)

    @pl.when(j == 0)
    def _init():
        out_ref[...] = jnp.zeros_like(out_ref)

    tm = out_ref.shape[0]
    acc = out_ref[...]

    if need_col_mask:
        # Hoisted once per grid step; per-slice threshold is a cheap scalar op.
        lane = lax.broadcasted_iota(jnp.int32, (tm, _LANES), 1)
        base = j * tv

    for s in range(tv // _LANES):
        xs = x_ref[:, s * _LANES:(s + 1) * _LANES].astype(jnp.float32)
        if need_col_mask:
            # Zero lanes past the true vocab (ragged last tile reads garbage).
            xs = jnp.where(lane < (size - (base + s * _LANES)), xs, 0.0)
        acc = acc + xs

    out_ref[...] = acc


def label_smoothing_loss(x, target, *, size, padding_idx, smoothing,
                         row_tile=128, vocab_tile_max=8192):
    """x: (N, size) log-probs (f32 or bf16), target: (N,) ints -> f32 scalar.

    Matches LabelSmoothing.forward == KLDivLoss(reduction='sum')(x, true_dist).
    """
    n, v = x.shape
    assert v == size
    assert size > 2, "smoothing / (size - 2) requires size > 2"

    smoothing = float(smoothing)
    confidence = 1.0 - smoothing
    fill = smoothing / (size - 2)
    log_conf = math.log(confidence) if confidence > 0.0 else 0.0
    log_fill = math.log(fill) if fill > 0.0 else 0.0

    target = target.astype(jnp.int32)

    # --- tiny row-sized gathers (done once, outside the kernel) ---
    x_pad_col = x[:, padding_idx].astype(jnp.float32)                      # (N,)
    x_tgt = jnp.take_along_axis(x, target[:, None], axis=1)[:, 0]          # (N,)
    x_tgt = x_tgt.astype(jnp.float32)
    row_ok = target != padding_idx

    # --- vocab (lane) tiling ---
    if v < _LANES:
        # Tiny vocab: zero-pad to one lane-dense tile (negligible HBM cost).
        x_k = jnp.pad(x, ((0, 0), (0, _LANES - v)))
        v_k, tv, need_col_mask = _LANES, _LANES, False
    else:
        x_k, v_k = x, v
        tv = min(_round_up(vocab_tile_max, _LANES), _round_up(v, _LANES))
        need_col_mask = (v % tv) != 0

    # --- row (sublane) tiling: multiple of 8, >= 2 tiles when possible (megacore)
    n8 = _round_up(n, 8)
    tm = max(8, min(int(row_tile), ((n8 // 2) // 8) * 8))

    grid = (pl.cdiv(n, tm), pl.cdiv(v_k, tv))

    kernel = functools.partial(_rowsum_kernel, size=size, tv=tv,
                               need_col_mask=need_col_mask)

    partials = pl.pallas_call(
        kernel,
        out_shape=jax.ShapeDtypeStruct((n, _LANES), jnp.float32),
        grid_spec=pltpu.PrefetchScalarGridSpec(
            num_scalar_prefetch=0,
            grid=grid,
            in_specs=[pl.BlockSpec((tm, tv), lambda i, j: (i, j))],
            out_specs=pl.BlockSpec((tm, _LANES), lambda i, j: (i, 0)),
        ),
        compiler_params=pltpu.CompilerParams(
            dimension_semantics=("parallel", "arbitrary"),
            vmem_limit_bytes=48 * 1024 * 1024),
    )(x_k)

    rowsum = jnp.sum(partials, axis=-1)                                    # (N,)

    const = fill * (size - 2) * log_fill + confidence * log_conf
    per_row = const - fill * rowsum + fill * x_pad_col + (fill - confidence) * x_tgt
    return jnp.sum(jnp.where(row_ok, per_row, 0.0))


def _reference_loss(x, target, *, size, padding_idx, smoothing):
    # Pure-JAX reference mirroring the PyTorch module (KLDivLoss, sum).
    n, v = x.shape
    confidence = 1.0 - smoothing
    fill = smoothing / (size - 2)
    cols = jnp.arange(v)[None, :]
    tgt = target.reshape(n, 1)
    td = jnp.full((n, v), fill, dtype=jnp.float32)
    td = jnp.where(cols == tgt, confidence, td)
    td = jnp.where(cols == padding_idx, 0.0, td)
    td = jnp.where(tgt == padding_idx, 0.0, td)
    xf = x.astype(jnp.float32)
    terms = jnp.where(td > 0, td * (jnp.log(jnp.where(td > 0, td, 1.0)) - xf), 0.0)
    return jnp.sum(terms)


def _run_case(key, n, size, padding_idx, smoothing, **tile_kwargs):
    k_logits, k_tgt = jax.random.split(key)
    logits = jax.random.normal(k_logits, (n, size), dtype=jnp.float32)
    x = jax.nn.log_softmax(logits, axis=-1)          # KLDivLoss expects log-probs
    target = jax.random.randint(k_tgt, (n,), 0, size, dtype=jnp.int32)
    target = target.at[1].set(padding_idx)           # exercise the padding-row path

    loss = label_smoothing_loss(
        x, target, size=size, padding_idx=padding_idx, smoothing=smoothing,
        **tile_kwargs)
    loss = jax.block_until_ready(loss)

    ref = _reference_loss(
        x, target, size=size, padding_idx=padding_idx, smoothing=smoothing)
    assert jnp.allclose(loss, ref, rtol=1e-4, atol=1e-3), (loss, ref)
    return loss


if __name__ == "__main__":
    key = jax.random.PRNGKey(0)
    k1, k2, k3 = jax.random.split(key, 3)

    # Small demo consistent with the module: N=8 tokens, vocab=32 (tiny-vocab path).
    _run_case(k1, n=8, size=32, padding_idx=0, smoothing=0.1)
    # Ragged vocab (not a multiple of 128) -> in-kernel edge mask; 3 row tiles.
    _run_case(k2, n=24, size=200, padding_idx=0, smoothing=0.1)
    # Multiple vocab tiles -> accumulation across the "arbitrary" grid axis.
    _run_case(k3, n=16, size=512, padding_idx=0, smoothing=0.1,
              row_tile=8, vocab_tile_max=128)

    print("KERNEL_OK")
</pallas_src>

<mosaic_0001>
module attributes {stable_mosaic.version = 11 : i64} {
  func.func @_rowsum_kernel(%arg0: i32, %arg1: i32, %arg2: memref<8x128xf32, #tpu.memory_space<vmem>>, %arg3: memref<8x128xf32, #tpu.memory_space<vmem>>) attributes {dimension_semantics = [#tpu.dimension_semantics<parallel>, #tpu.dimension_semantics<arbitrary>], iteration_bounds = array<i64: 1, 1>, scalar_prefetch = 0 : i64, scratch_operands = 0 : i64, tpu.core_type = #tpu.core_type<tc>, window_params = [{transform_indices = @transform_0, window_bounds = array<i64: 8, 128>}, {transform_indices = @transform_1, window_bounds = array<i64: 8, 128>}]} {
    %c0_i32 = arith.constant 0 : i32
    %0 = arith.cmpi eq, %arg1, %c0_i32 : i32
    %1 = arith.extui %0 : i1 to i32
    %c0_i32_0 = arith.constant 0 : i32
    %2 = arith.cmpi ne, %1, %c0_i32_0 : i32
    scf.if %2 {
      %cst = arith.constant 0.000000e+00 : f32
      %7 = vector.broadcast %cst : f32 to vector<8x128xf32>
      %c0_6 = arith.constant 0 : index
      %c0_7 = arith.constant 0 : index
      %8 = vector.load %arg3[%c0_6, %c0_7] : memref<8x128xf32, #tpu.memory_space<vmem>>, vector<8x128xf32>
      tpu.vector_store %arg3[%c0_6, %c0_7], %7 {strides = array<i32>} : memref<8x128xf32, #tpu.memory_space<vmem>>, vector<8x128xf32>,
    } else {
    }
    %c0 = arith.constant 0 : index
    %c0_1 = arith.constant 0 : index
    %3 = vector.load %arg3[%c0, %c0_1] : memref<8x128xf32, #tpu.memory_space<vmem>>, vector<8x128xf32>
    %c0_2 = arith.constant 0 : index
    %c0_3 = arith.constant 0 : index
    %4 = vector.load %arg2[%c0_2, %c0_3] : memref<8x128xf32, #tpu.memory_space<vmem>>, vector<8x128xf32>
    %5 = arith.addf %3, %4 : vector<8x128xf32>
    %c0_4 = arith.constant 0 : index
    %c0_5 = arith.constant 0 : index
    %6 = vector.load %arg3[%c0_4, %c0_5] : memref<8x128xf32, #tpu.memory_space<vmem>>, vector<8x128xf32>
    tpu.vector_store %arg3[%c0_4, %c0_5], %5 {strides = array<i32>} : memref<8x128xf32, #tpu.memory_space<vmem>>, vector<8x128xf32>,
    return
  }
  func.func @transform_0(%arg0: i32, %arg1: i32) -> (i32, i32) {
    %c0_i32 = arith.constant 0 : i32
    return %arg0, %arg1 : i32, i32
  }
  func.func @transform_1(%arg0: i32, %arg1: i32) -> (i32, i32) {
    %c0_i32 = arith.constant 0 : i32
    %c0_i32_0 = arith.constant 0 : i32
    return %arg0, %c0_i32 : i32, i32
  }
}

</mosaic_0001>

<bundles_post_ra>
// kernel: tpu_custom_call.1
= control target key start
LH: loop header
LB: loop body
LE: loop exit
PB: predicated region body
PF: predicated region fallthrough
CT: control target
= control target key end

     0   :  { %6 = vsyncpa [#allocation3], 0  ;;  %s122_s0 = inlined_call_operand.hbm [shape: f32[8,128], index: 0, kind: input, shape index: {}]   ;;  %s123_s1 = inlined_call_operand.hbm [shape: f32[8,128], index: 1, kind: output, shape index: {}]  }
   0x1   :  { %7 = vsyncpa [#allocation4], 0  ;;  %s13_s8 = sshll.u32 %s122_s0, 4  ;;  %s104_s9 = smov [#allocation2]   ;;  %s14_s8 = int_to_ptr.hbm [resolvable:$true] %s13_s8 }
   0x2   :  { %s15_s10 = sshll.u32 %s104_s9, 4  ;;  %s16_s10 = int_to_ptr.vmem [resolvable:$true] %s15_s10 }
   0x3   :  { %18 = dma.hbm_to_vmem [thread:$0]  %s14_s8, 128, %s16_s10, [#allocation3]  }
   0x4   :  { %100 = dma.done.wait [#allocation3], 128  }
   0x5   :  { %101 = vsyncadd [#allocation3], 4294967168  ;;  %s105_s11 = smov [#allocation5]   ;;  %s39_s15 = sshll.u32 %s123_s1, 4  ;;  %v29_v0 = vld [vmem:[#allocation2] sm:$0xff]  ;;  %s40_s15 = int_to_ptr.hbm [resolvable:$true] %s39_s15 }
   0x6   :  { %s37_s12 = sshll.u32 %s105_s11, 4  ;;  %31 = vst [vmem:[#allocation5] sm:$0xff] %v29_v0  ;;  %s38_s12 = int_to_ptr.vmem [resolvable:$true] %s37_s12 }
   0x7   :  { %42 = dma.vmem_to_hbm [thread:$0]  %s38_s12, 128, %s40_s15, [#allocation4]  }
   0x8   :  { %102 = dma.done.wait [#allocation4], 128  }
   0x9   :  { %103 = vsyncadd [#allocation4], 4294967168 }
   0xa   :  { %47 = vsyncpa [#allocation3], 1 }
   0xb   :  { %48 = vsyncpa [#allocation4], 1 }

</bundles_post_ra>
